<compile_context>
chip_gen: v7x
topology: tpu7x:2x2x1
jax: 0.10.0
libtpu: 0.0.40
codegen_flags: <defaults>
</compile_context>

<pallas_src>
import jax
import jax.numpy as jnp
from jax.experimental import pallas as pl
from jax.experimental.pallas import tpu as pltpu

_LANE = 128
_TILE_L_MAX = 2048  # output lanes per grid step (>=512 is already ~85% of HBM roofline)


def _round_up(x: int, m: int) -> int:
    return ((x + m - 1) // m) * m


def _make_butterfly_kernel(num_taps: int, tile_l: int, k_pad: int):
    def kernel(win_ref, w_ref, o_ref):
        # win_ref: (1, 4, tile_win) f32 : halo'd window, rows = [x_r, x_i, y_r, y_i]
        # w_ref:   (4, k_pad)       f32 : W[r, 4k + c] = taps[c + 4r, k]
        # o_ref:   (4, tile_l)      f32 : rows = result[0..3] for this time tile
        full = win_ref[0]  # (4, tile_win)

        # Stack the T shifted channel windows along the contraction (K) axis:
        #   stacked[4k + c, j] = chan_c[tile_start + j + (T - 1 - k)]
        parts = [
            full[:, (num_taps - 1 - k):(num_taps - 1 - k) + tile_l]
            for k in range(num_taps)
        ]
        if k_pad > 4 * num_taps:  # pad K up to a multiple of 8 if T is odd
            parts.append(jnp.zeros((k_pad - 4 * num_taps, tile_l), jnp.float32))
        stacked = jnp.concatenate(parts, axis=0)  # (k_pad, tile_l)

        # Single MXU matmul per tile, f32 accumulation.
        o_ref[...] = jnp.dot(w_ref[...], stacked, preferred_element_type=jnp.float32)

    return kernel


def butterfly4x4_forward(y: jax.Array, taps: jax.Array) -> jax.Array:
    """y: (N, 2) complex64, taps: (16, T) real -> (2*(N-T+1),) complex64."""
    assert y.ndim == 2 and y.shape[1] == 2
    assert taps.ndim == 2 and taps.shape[0] == 16
    n = y.shape[0]
    t = taps.shape[1]
    l = n - t + 1
    assert l > 0

    # --- static tiling parameters ---
    tile_l = min(_TILE_L_MAX, _round_up(l, _LANE))
    n_tiles = pl.cdiv(l, tile_l)
    l_pad = n_tiles * tile_l
    halo = _round_up(t - 1, _LANE) if t > 1 else 0
    tile_win = tile_l + halo
    k_pad = _round_up(4 * t, 8)

    # 4 real channels on the sublane axis, time on the lane axis.
    sig = jnp.stack(
        [y[:, 0].real, y[:, 0].imag, y[:, 1].real, y[:, 1].imag], axis=0
    ).astype(jnp.float32)                                            # (4, N)
    sig_full = jnp.zeros((4, l_pad + halo), jnp.float32).at[:, :n].set(sig)

    # Overlapping (halo'd) per-tile windows: windows[i, :, m] = sig_full[:, i*tile_l + m].
    # Built with reshapes/slices only (no gather), which lowers to cheap XLA copies.
    main = jnp.transpose(
        sig_full[:, :l_pad].reshape(4, n_tiles, tile_l), (1, 0, 2)
    )                                                                # (n_tiles, 4, tile_l)
    if halo == 0:
        windows = main
    elif halo <= tile_l:
        sig_halo = sig_full[:, tile_l:]                              # (4, (n_tiles-1)*tile_l + halo)
        pad_amt = n_tiles * tile_l - sig_halo.shape[1]               # = tile_l - halo >= 0
        sig_halo = jnp.pad(sig_halo, ((0, 0), (0, pad_amt)))
        halo_w = jnp.transpose(
            sig_halo.reshape(4, n_tiles, tile_l)[:, :, :halo], (1, 0, 2)
        )                                                            # (n_tiles, 4, halo)
        windows = jnp.concatenate([main, halo_w], axis=-1)           # (n_tiles, 4, tile_win)
    else:
        # Very long filters (t - 1 > tile_l): fall back to a gather-based window build.
        starts = jnp.arange(n_tiles)[:, None] * tile_l
        idx = starts + jnp.arange(tile_win)[None, :]                 # (n_tiles, tile_win)
        windows = jnp.transpose(sig_full[:, idx], (1, 0, 2))         # (n_tiles, 4, tile_win)

    # Dense lane-contiguous weight slab: W[r, 4k + c] = taps[c + 4r, k].
    w_rck = taps.astype(jnp.float32).reshape(4, 4, t)                # [r, c, k]
    w_rkc = jnp.transpose(w_rck, (0, 2, 1)).reshape(4, 4 * t)        # [r, 4k + c]
    w = jnp.zeros((4, k_pad), jnp.float32).at[:, :4 * t].set(w_rkc)

    out = pl.pallas_call(
        _make_butterfly_kernel(t, tile_l, k_pad),
        out_shape=jax.ShapeDtypeStruct((4, l_pad), jnp.float32),
        grid=(n_tiles,),
        in_specs=[
            pl.BlockSpec((1, 4, tile_win), lambda i: (i, 0, 0)),
            pl.BlockSpec((4, k_pad), lambda i: (0, 0)),
        ],
        out_specs=pl.BlockSpec((4, tile_l), lambda i: (0, i)),
        compiler_params=pltpu.CompilerParams(
            dimension_semantics=("parallel",),
            vmem_limit_bytes=32 * 1024 * 1024,
        ),
    )(windows, w)

    r = out[:, :l]
    pol_x = (r[0] + 1j * r[1]).astype(jnp.complex64)
    pol_y = (r[2] + 1j * r[3]).astype(jnp.complex64)
    return jnp.concatenate([pol_x, pol_y])


def butterfly4x4_reference(y: jax.Array, taps: jax.Array) -> jax.Array:
    """Pure-JAX reference (direct 'valid' convolutions, same semantics as overlap-save)."""
    chans = [y[:, 0].real, y[:, 0].imag, y[:, 1].real, y[:, 1].imag]
    chans = [c.astype(jnp.float32) for c in chans]
    taps = taps.astype(jnp.float32)
    res = []
    for row in range(4):
        s = sum(
            jnp.convolve(chans[c], taps[c + 4 * row], mode="valid") for c in range(4)
        )
        res.append(s)
    return jnp.concatenate(
        [res[0] + 1j * res[1], res[2] + 1j * res[3]]
    ).astype(jnp.complex64)


if __name__ == "__main__":
    key = jax.random.PRNGKey(0)

    # Two sizes: one single-tile, one that exercises the multi-tile halo'd path.
    for n_samples, num_taps in [(64, 8), (2600, 8)]:
        key, k_re, k_im, k_taps = jax.random.split(key, 4)

        y = (
            jax.random.normal(k_re, (n_samples, 2), dtype=jnp.float32)
            + 1j * jax.random.normal(k_im, (n_samples, 2), dtype=jnp.float32)
        ).astype(jnp.complex64)
        # Deterministic synthetic taps (module default would be ones((16, num_taps))).
        taps = 0.1 * jax.random.normal(k_taps, (16, num_taps), dtype=jnp.float32)

        out = jax.block_until_ready(butterfly4x4_forward(y, taps))
        ref = jax.block_until_ready(butterfly4x4_reference(y, taps))

        assert out.shape == (2 * (n_samples - num_taps + 1),)
        assert out.dtype == jnp.complex64
        assert jnp.allclose(out, ref, atol=1e-4, rtol=1e-4), (n_samples, num_taps)

    print("KERNEL_OK")
</pallas_src>

<mosaic_0001>
module attributes {stable_mosaic.version = 11 : i64} {
  func.func @kernel(%arg0: i32, %arg1: memref<1x4x256xf32, #tpu.memory_space<vmem>>, %arg2: memref<4x32xf32, #tpu.memory_space<vmem>>, %arg3: memref<4x128xf32, #tpu.memory_space<vmem>>) attributes {dimension_semantics = [#tpu.dimension_semantics<parallel>], iteration_bounds = array<i64: 1>, scalar_prefetch = 0 : i64, scratch_operands = 0 : i64, tpu.core_type = #tpu.core_type<tc>, window_params = [{transform_indices = @transform_0, window_bounds = array<i64: 1, 4, 256>}, {pipeline_mode = #tpu.pipeline_mode<synchronous>, transform_indices = @transform_1, window_bounds = array<i64: 4, 32>}, {transform_indices = @transform_2, window_bounds = array<i64: 4, 128>}]} {
    %c0 = arith.constant 0 : index
    %c0_0 = arith.constant 0 : index
    %c0_1 = arith.constant 0 : index
    %0 = vector.load %arg1[%c0, %c0_0, %c0_1] : memref<1x4x256xf32, #tpu.memory_space<vmem>>, vector<1x4x256xf32>
    %1 = vector.shape_cast %0 : vector<1x4x256xf32> to vector<4x256xf32>
    %2 = vector.extract_strided_slice %1 {offsets = [0, 7], sizes = [4, 128], strides = [1, 1]} : vector<4x256xf32> to vector<4x128xf32>
    %3 = vector.extract_strided_slice %1 {offsets = [0, 6], sizes = [4, 128], strides = [1, 1]} : vector<4x256xf32> to vector<4x128xf32>
    %4 = vector.extract_strided_slice %1 {offsets = [0, 5], sizes = [4, 128], strides = [1, 1]} : vector<4x256xf32> to vector<4x128xf32>
    %5 = vector.extract_strided_slice %1 {offsets = [0, 4], sizes = [4, 128], strides = [1, 1]} : vector<4x256xf32> to vector<4x128xf32>
    %6 = vector.extract_strided_slice %1 {offsets = [0, 3], sizes = [4, 128], strides = [1, 1]} : vector<4x256xf32> to vector<4x128xf32>
    %7 = vector.extract_strided_slice %1 {offsets = [0, 2], sizes = [4, 128], strides = [1, 1]} : vector<4x256xf32> to vector<4x128xf32>
    %8 = vector.extract_strided_slice %1 {offsets = [0, 1], sizes = [4, 128], strides = [1, 1]} : vector<4x256xf32> to vector<4x128xf32>
    %9 = vector.extract_strided_slice %1 {offsets = [0, 0], sizes = [4, 128], strides = [1, 1]} : vector<4x256xf32> to vector<4x128xf32>
    %10 = tpu.concatenate %2, %3, %4, %5, %6, %7, %8, %9 in 0 : vector<4x128xf32>, vector<4x128xf32>, vector<4x128xf32>, vector<4x128xf32>, vector<4x128xf32>, vector<4x128xf32>, vector<4x128xf32>, vector<4x128xf32> -> vector<32x128xf32>
    %c0_2 = arith.constant 0 : index
    %c0_3 = arith.constant 0 : index
    %11 = vector.load %arg2[%c0_2, %c0_3] : memref<4x32xf32, #tpu.memory_space<vmem>>, vector<4x32xf32>
    %cst = arith.constant dense<0.000000e+00> : vector<4x128xf32>
    %12 = tpu.matmul %11, %10, %cst {dimension_numbers = #tpu.dot_dimension_numbers<[1], [0], [0], [1], [0, 0, 1, 1], [], []>} : vector<4x32xf32>, vector<32x128xf32>, vector<4x128xf32> -> vector<4x128xf32>
    %c0_4 = arith.constant 0 : index
    %c0_5 = arith.constant 0 : index
    %13 = vector.load %arg3[%c0_4, %c0_5] : memref<4x128xf32, #tpu.memory_space<vmem>>, vector<4x128xf32>
    tpu.vector_store %arg3[%c0_4, %c0_5], %12 {strides = array<i32>} : memref<4x128xf32, #tpu.memory_space<vmem>>, vector<4x128xf32>,
    return
  }
  func.func @transform_0(%arg0: i32) -> (i32, i32, i32) {
    %c0_i32 = arith.constant 0 : i32
    %c0_i32_0 = arith.constant 0 : i32
    %c0_i32_1 = arith.constant 0 : i32
    return %arg0, %c0_i32, %c0_i32_0 : i32, i32, i32
  }
  func.func @transform_1(%arg0: i32) -> (i32, i32) {
    %c0_i32 = arith.constant 0 : i32
    %c0_i32_0 = arith.constant 0 : i32
    %c0_i32_1 = arith.constant 0 : i32
    return %c0_i32, %c0_i32_0 : i32, i32
  }
  func.func @transform_2(%arg0: i32) -> (i32, i32) {
    %c0_i32 = arith.constant 0 : i32
    %c0_i32_0 = arith.constant 0 : i32
    return %c0_i32, %arg0 : i32, i32
  }
}

</mosaic_0001>

<bundles_post_ra>
// kernel: tpu_custom_call.1
= control target key start
LH: loop header
LB: loop body
LE: loop exit
PB: predicated region body
PF: predicated region fallthrough
CT: control target
= control target key end

     0   :  { %7 = vsyncpa [#allocation3], 0  ;;  %s462_s0 = inlined_call_operand.hbm [shape: f32[1,4,256], index: 0, kind: input, shape index: {}]   ;;  %s463_s1 = inlined_call_operand.hbm [shape: f32[4,32], index: 1, kind: input, shape index: {}]   ;;  %s464_s2 = inlined_call_operand.hbm [shape: f32[4,128], index: 2, kind: output, shape index: {}]  }
   0x1   :  { %8 = vsyncpa [#allocation6], 0 }
   0x2   :  { %9 = vsyncpa [#allocation4], 0  ;;  %s387_s9 = smov [#allocation2]   ;;  %s388_s11 = smov [#allocation5]  }
   0x3   :  { %s16_s10 = sshll.u32 %s387_s9, 4  ;;  %s26_s12 = sshll.u32 %s388_s11, 4  ;;  %s17_s10 = int_to_ptr.vmem [resolvable:$true] %s16_s10  ;;  %s27_s12 = int_to_ptr.vmem [resolvable:$true] %s26_s12 }
   0x4   :  { %s315_s15 = scalar_lea.hbm %s462_s0, 128 }
   0x5   :  { %p316_p0 = scmp.ne.s32.totalorder %s462_s0, %s315_s15  ;;  %p319_p1 = scmp.lt.u32.totalorder %s315_s15, %s462_s0 }
   0x7   :  { %p321_p2 = pnand %p319_p1, %p316_p0 }
   0x9   :  { %324 = shalt.err (!%p321_p2)
}
   0xa   :  { %s325_s20 = scalar_lea.vmem %s17_s10, 128  ;;  %p330_p4 = scmp.lt.s32.totalorder %s17_s10, %s17_s10 }
   0xb   :  { %p326_p3 = scmp.ne.s32.totalorder %s17_s10, %s325_s20  ;;  %p331_p5 = scmp.lt.s32.totalorder %s325_s20, %s325_s20 }
   0xd   :  { %p332_p6 = por %p331_p5, %p330_p4 }
   0xf   :  { %p333_p7 = pnand %p332_p6, %p326_p3 }
  0x11   :  { %336 = shalt.err (!%p333_p7)
}
  0x12   :  { %19 = dma.hbm_to_vmem [thread:$0]  %s462_s0, 128, %s17_s10, [#allocation3]  }
  0x13   :  { %s337_s25 = scalar_lea.hbm %s463_s1, 64 }
  0x14   :  { %p338_p8 = scmp.ne.s32.totalorder %s463_s1, %s337_s25  ;;  %p341_p9 = scmp.lt.u32.totalorder %s337_s25, %s463_s1 }
  0x16   :  { %p343_p10 = pnand %p341_p9, %p338_p8 }
  0x18   :  { %346 = shalt.err (!%p343_p10)
}
  0x19   :  { %s347_s30 = scalar_lea.vmem %s27_s12, 64  ;;  %p352_p12 = scmp.lt.s32.totalorder %s27_s12, %s27_s12 }
  0x1a   :  { %p348_p11 = scmp.ne.s32.totalorder %s27_s12, %s347_s30  ;;  %p353_p13 = scmp.lt.s32.totalorder %s347_s30, %s347_s30 }
  0x1c   :  { %p354_p0 = por %p353_p13, %p352_p12 }
  0x1e   :  { %p355_p1 = pnand %p354_p0, %p348_p11 }
  0x20   :  { %358 = shalt.err (!%p355_p1)
}
  0x21   :  { %29 = dma.hbm_to_vmem [thread:$0]  %s463_s1, 64, %s27_s12, [#allocation6]  }
  0x22   :  { %381 = dma.done.wait [#allocation3], 128  }
  0x23   :  { %382 = vsyncadd [#allocation3], 4294967168 }
  0x24   :  { %383 = dma.done.wait [#allocation6], 64  }
  0x25   :  { %384 = vsyncadd [#allocation6], 4294967232  ;;  %v36_v0 = vld [vmem:[#allocation2] sm:$0xff]  ;;  %s389_s4 = smov 1   ;;  %s390_s5 = smov 3   ;;  %vm45_vm0 = vcmask 7168  }
  0x26   :  { %v40_v1 = vcombine.low %v36_v0, %v36_v0  ;;  %v38_v2 = vcombine.high %v36_v0, %v36_v0  ;;  %s391_s6 = smov 2   ;;  %s392_s7 = smov 4   ;;  %vm92_vm1 = vcmask 1043456   ;;  %vm61_vm2 = vcmask 23552   ;;  %v101_v62 = vld [vmem:[#allocation5] sm:$0xf] }
  0x27   :  { %s393_s8 = smov 5   ;;  %s394_s1 = smov 6   ;;  %v396_v13 = vmov 0.0|0.0   ;;  %vm53_vm3 = vcmask 15360   ;;  %vm69_vm4 = vcmask 31744   ;;  %vm77_vm5 = vcmask 39936  }
  0x28   :  { %v263_v3 = vpack.i.bf16 %v36_v0, %v40_v1  ;;  %v268_v4 = vpack.i.bf16 %v38_v2, %v36_v0  ;;  %s395_s9 = smov 7   ;;  %243 = vmatprep.subr.bf16.mxu0 %v396_v13  ;;  %s397_s10 = smov 121   ;;  %vm85_vm6 = vcmask 48128   ;;  %vm398_vm7 = vmmov 0  }
  0x29   :  { %v399_v32 = vmov 0.0   ;;  %vm126_vm8 = vcmask 990208   ;;  %vm135_vm9 = vcmask 261120   ;;  %s400_s11 = smov [#allocation7]  }
  0x2a   :  { %264 = vrot.lane.b32.xlu0 %v263_v3, %s389_s4  ;;  %274 = vrot.lane.b32.xlu1 %v263_v3, %s390_s5  ;;  %s216_s12 = sshll.u32 %s400_s11, 4  ;;  %s217_s12 = int_to_ptr.vmem [resolvable:$true] %s216_s12 }
  0x2b   :  { %240 = vmatprep.mubr.msk.f32.mxu0 %vm398_vm7, %v399_v32  ;;  %s359_s13 = scalar_lea.vmem %s217_s12, 64  ;;  %p364_p3 = scmp.lt.s32.totalorder %s217_s12, %s217_s12 }
  0x2c   :  { %p360_p2 = scmp.ne.s32.totalorder %s217_s12, %s359_s13  ;;  %p365_p4 = scmp.lt.s32.totalorder %s359_s13, %s359_s13 }
  0x2e   :  { %269 = vrot.lane.b32.xlu0 %v268_v4, %s391_s6  ;;  %279 = vrot.lane.b32.xlu1 %v268_v4, %s392_s7  ;;  %p366_p5 = por %p365_p4, %p364_p3 }
  0x30   :  { %p367_p6 = pnand %p366_p5, %p360_p2 }
  0x32   :  { %284 = vrot.lane.b32.xlu0 %v263_v3, %s393_s8  ;;  %289 = vrot.lane.b32.xlu1 %v268_v4, %s394_s1 }
  0x36   :  { %89 = vrot.lane.b32.xlu0 %v40_v1, %s395_s9 }
  0x9c   :  { %v265_v5 = vpop.permute.xlu0 %264  ;;  %v275_v6 = vpop.permute.xlu1 %274 }
  0x9d   :  { %v267_v7 = vunpack.i.h.bf16 %v265_v5  ;;  %v266_v8 = vunpack.i.l.bf16 %v265_v5  ;;  %v277_v9 = vunpack.i.h.bf16 %v275_v6  ;;  %v276_v10 = vunpack.i.l.bf16 %v275_v6 }
  0x9f   :  { %v46_v11 = vsel %vm45_vm0, %v266_v8, %v267_v7  ;;  %v93_v12 = vsel %vm92_vm1, %v36_v0, %v266_v8  ;;  %v62_v19 = vsel %vm61_vm2, %v276_v10, %v277_v9 }
  0xa0   :  { %v270_v14 = vpop.permute.xlu0 %269  ;;  %v280_v15 = vpop.permute.xlu1 %279  ;;  %v94_v16 = vsel %vm92_vm1, %v38_v2, %v46_v11 }
  0xa1   :  { %v272_v17 = vunpack.i.h.bf16 %v270_v14  ;;  %v271_v18 = vunpack.i.l.bf16 %v270_v14  ;;  %v293_v20 = vpack.i.bf16 %v94_v16, %v93_v12  ;;  %v282_v22 = vunpack.i.h.bf16 %v280_v15 }
  0xa2   :  { %v281_v23 = vunpack.i.l.bf16 %v280_v15 }
  0xa3   :  { %v54_v21 = vsel %vm53_vm3, %v271_v18, %v272_v17  ;;  %v95_v24 = vsel %vm92_vm1, %v271_v18, %v276_v10  ;;  %294 = vrot.lane.b32.xlu1 %v293_v20, %s397_s10 }
  0xa4   :  { %v285_v25 = vpop.permute.xlu0 %284  ;;  %v290_v26 = vpop.permute.xlu1 %289  ;;  %v96_v27 = vsel %vm92_vm1, %v54_v21, %v62_v19  ;;  %v70_v34 = vsel %vm69_vm4, %v281_v23, %v282_v22 }
  0xa5   :  { %v287_v28 = vunpack.i.h.bf16 %v285_v25  ;;  %v286_v29 = vunpack.i.l.bf16 %v285_v25  ;;  %v292_v30 = vunpack.i.h.bf16 %v290_v26  ;;  %v291_v31 = vunpack.i.l.bf16 %v290_v26 }
  0xa6   :  { %v298_v33 = vpack.i.bf16 %v96_v27, %v95_v24 }
  0xa7   :  { %v78_v35 = vsel %vm77_vm5, %v286_v29, %v287_v28  ;;  %v86_v36 = vsel %vm85_vm6, %v291_v31, %v292_v30  ;;  %v97_v37 = vsel %vm92_vm1, %v281_v23, %v286_v29 }
  0xa8   :  { %299 = vrot.lane.b32.xlu0 %v298_v33, %s397_s10  ;;  %v90_v38 = vpop.permute.xlu0 %89  ;;  %v98_v39 = vsel %vm92_vm1, %v70_v34, %v78_v35 }
  0xa9   :  { %v99_v40 = vsel %vm92_vm1, %v291_v31, %v90_v38  ;;  %v100_v41 = vsel %vm92_vm1, %v86_v36, %v90_v38  ;;  %v303_v42 = vpack.i.bf16 %v98_v39, %v97_v37 }
  0xaa   :  { %v308_v43 = vpack.i.bf16 %v100_v41, %v99_v40 }
  0xab   :  { %304 = vrot.lane.b32.xlu1 %v303_v42, %s397_s10 }
  0xac   :  { %309 = vrot.lane.b32.xlu0 %v308_v43, %s397_s10 }
 0x115   :  { %v295_v44 = vpop.permute.xlu1 %294 }
 0x116   :  { %v297_v45 = vunpack.i.h.bf16 %v295_v44  ;;  %v296_v46 = vunpack.i.l.bf16 %v295_v44 }
 0x118   :  { %v127_v51 = vsel %vm126_vm8, %v296_v46, %v297_v45 }
 0x11a   :  { %v300_v47 = vpop.permute.xlu0 %299 }
 0x11b   :  { %v302_v48 = vunpack.i.h.bf16 %v300_v47  ;;  %v301_v49 = vunpack.i.l.bf16 %v300_v47 }
 0x11d   :  { %v305_v50 = vpop.permute.xlu1 %304  ;;  %v128_v52 = vsel %vm126_vm8, %v301_v49, %v302_v48 }
 0x11e   :  { %v307_v53 = vunpack.i.h.bf16 %v305_v50  ;;  %v306_v54 = vunpack.i.l.bf16 %v305_v50  ;;  %v310_v55 = vpop.permute.xlu0 %309  ;;  %v244_v56 = vpack.c.bf16 %v128_v52, %v127_v51 }
 0x11f   :  { %v312_v57 = vunpack.i.h.bf16 %v310_v55  ;;  %v311_v58 = vunpack.i.l.bf16 %v310_v55 }
 0x120   :  { %245 = vmatpush3.bf16.msra.mxu0 %v244_v56  ;;  %v129_v59 = vsel %vm126_vm8, %v306_v54, %v307_v53 }
 0x121   :  { %246 = vmatprep.subr.bf16.mxu0 %v396_v13  ;;  %v130_v60 = vsel %vm126_vm8, %v311_v58, %v312_v57 }
 0x122   :  { %v247_v61 = vpack.c.bf16 %v130_v60, %v129_v59 }
 0x124   :  { %248 = vmatpush3.bf16.msra.mxu0 %v247_v61 }
 0x127   :  { %241 = vmatmul.mubr.msk.f32.vlgmr.msra.gmra.mrb[0].mxu0 %vm135_vm9, %v101_v62 }
 0x1fa   :  { %v205_v63 = vpop.f32.mrb[0].mxu0 }
 0x1fb   :  { %209 = vst [vmem:[#allocation7] sm:$0xf] %v205_v63  ;;  %v242_v0 = vpop.f32.mrb[1].mxu0 }
 0x1fc   :  { %370 = shalt.err (!%p367_p6)
}
 0x1fd   :  { %s371_s16 = scalar_lea.hbm %s464_s2, 64 }
 0x1fe   :  { %p372_p7 = scmp.ne.s32.totalorder %s464_s2, %s371_s16  ;;  %p375_p8 = scmp.lt.u32.totalorder %s371_s16, %s464_s2 }
 0x200   :  { %p377_p9 = pnand %p375_p8, %p372_p7 }
 0x202   :  { %380 = shalt.err (!%p377_p9)
}
 0x203   :  { %219 = dma.vmem_to_hbm [thread:$0]  %s217_s12, 64, %s464_s2, [#allocation4]  }
 0x204   :  { %385 = dma.done.wait [#allocation4], 64  }
 0x205   :  { %386 = vsyncadd [#allocation4], 4294967232 }
 0x206   :  { %223 = vsyncpa [#allocation3], 1 }
 0x207   :  { %224 = vsyncpa [#allocation6], 1 }
 0x208   :  { %225 = vsyncpa [#allocation4], 1 }

</bundles_post_ra>
